<compile_context>
chip_gen: v7x
topology: tpu7x:2x2x1
jax: 0.10.0
libtpu: 0.0.40
codegen_flags: <defaults>
</compile_context>

<pallas_src>
import functools

import numpy as np
import jax
import jax.numpy as jnp
from jax import lax
from jax.experimental import pallas as pl
from jax.experimental.pallas import tpu as pltpu


# ----------------------------- fused kernel ---------------------------------

def gnn_fused_kernel(a_ref, x_ref, w1_ref, b1_ref, w2_ref, b2_ref,
                     w3_ref, b3_ref, ps_ref, pt_ref, o_ref):
    """One invocation: 3-layer GCN for both graph sides (intermediates kept in
    vregs) + the 3 resized similarity maps for every batch in this block."""
    w1, w2, w3 = w1_ref[...], w2_ref[...], w3_ref[...]
    b1, b2, b3 = b1_ref[...], b2_ref[...], b3_ref[...]

    def gcn_stack(side):
        a = a_ref[side]                                   # (Np, Np)
        x = x_ref[side]                                   # (Np, Cin)
        # layer 1: Cin(4) < Cout(64) -> contract A with the narrow operand
        # first ((A@X)@W1; tiny rounding delta vs A@(X@W1), covered by tol).
        ax = jnp.dot(a, x, preferred_element_type=jnp.float32)
        h1 = jnp.maximum(
            jnp.dot(ax, w1, preferred_element_type=jnp.float32) + b1, 0.0)
        # layers 2/3: Cin > Cout -> (H @ W) first, then A @ (.)
        h2 = jnp.maximum(
            jnp.dot(a, jnp.dot(h1, w2, preferred_element_type=jnp.float32),
                    preferred_element_type=jnp.float32) + b2, 0.0)
        h3 = jnp.maximum(
            jnp.dot(a, jnp.dot(h2, w3, preferred_element_type=jnp.float32),
                    preferred_element_type=jnp.float32) + b3, 0.0)
        return h1, h2, h3

    hs = gcn_stack(0)   # source side ("i") embeddings, live in vregs
    ht = gcn_stack(1)   # target side ("j") embeddings, live in vregs

    bb = o_ref.shape[0]
    for b in range(bb):                 # static unrolled loop over this block
        ps = ps_ref[b]                  # (R, Np) = W_interp @ Gather_s
        pt = pt_ref[b]                  # (R, Np) = W_interp @ Gather_t
        for l, (hs_l, ht_l) in enumerate(zip(hs, ht)):
            ys = jnp.dot(ps, hs_l, preferred_element_type=jnp.float32)  # (R,F)
            yt = jnp.dot(pt, ht_l, preferred_element_type=jnp.float32)  # (R,F)
            # (R,R) map = ys @ yt^T: contraction over the feature axis of BOTH
            # operands — no transpose materialized, MXU handles the RHS order.
            sim = lax.dot_general(ys, yt, (((1,), (1,)), ((), ())),
                                  preferred_element_type=jnp.float32)
            # TODO(synk): if R grows, pack the 3 maps into one (R, 3R)
            # lane-dense slab instead of three R-lane masked stores.
            o_ref[b, l] = sim.astype(o_ref.dtype)


def gnn_layers_forward(a_stack, x_stack, params, ps, pt, *, batch_block):
    """Full GNNLayers forward in one pallas_call. Returns 3 x (B, 1, R, R)."""
    w1, b1, w2, b2, w3, b3 = params
    nsides, n_pad, cin = x_stack.shape
    B, R, _ = ps.shape
    bb = batch_block
    assert B % bb == 0
    c1, c2, c3 = w1.shape[1], w2.shape[1], w3.shape[1]
    rep2 = lambda i: (0, 0)
    rep3 = lambda i: (0, 0, 0)
    # TODO(synk): replicated operands (constant index_map) could be marked
    # pipeline_mode=pl.Buffered(1) / hoisted to scratch; irrelevant for the
    # single-grid-step path used on v5e/v6e.
    out = pl.pallas_call(
        gnn_fused_kernel,
        out_shape=jax.ShapeDtypeStruct((B, 3, R, R), jnp.float32),
        grid=(B // bb,),
        in_specs=[
            pl.BlockSpec((nsides, n_pad, n_pad), rep3),          # A, both sides
            pl.BlockSpec((nsides, n_pad, cin), rep3),            # X, both sides
            pl.BlockSpec((cin, c1), rep2), pl.BlockSpec((1, c1), rep2),
            pl.BlockSpec((c1, c2), rep2), pl.BlockSpec((1, c2), rep2),
            pl.BlockSpec((c2, c3), rep2), pl.BlockSpec((1, c3), rep2),
            pl.BlockSpec((bb, R, n_pad), lambda i: (i, 0, 0)),   # P_s
            pl.BlockSpec((bb, R, n_pad), lambda i: (i, 0, 0)),   # P_t
        ],
        out_specs=pl.BlockSpec((bb, 3, R, R), lambda i: (i, 0, 0, 0)),
        compiler_params=pltpu.CompilerParams(
            dimension_semantics=("parallel",)),
    )(a_stack, x_stack, w1, b1.reshape(1, -1), w2, b2.reshape(1, -1),
      w3, b3.reshape(1, -1), ps, pt)
    return out[:, 0:1], out[:, 1:2], out[:, 2:3]


def pick_batch_block(num_graphs):
    """Grid policy: v7x (2 TCs/chip) -> B-wide parallel grid so batches shard
    across cores; v5e/v6e (1 TC) -> collapse to a single grid step (grid
    iteration there is just a serial loop costing ~0.35us/step)."""
    try:
        kind = jax.devices()[0].device_kind.lower()
    except Exception:
        kind = ""
    two_tc = "v7" in kind
    return 1 if (two_tc and num_graphs > 1) else num_graphs


# ------------------------------- host glue ----------------------------------

def normalized_adjacency(edge_index, num_nodes):
    """Dense D^-1/2 (A + I) D^-1/2 matching PyG GCNConv's gcn_norm."""
    a = np.zeros((num_nodes, num_nodes), np.float32)
    src, dst = edge_index
    a[dst, src] = 1.0
    idx = np.arange(num_nodes)
    a[idx, idx] = 1.0  # self loops
    deg = a.sum(axis=1)
    dinv = np.where(deg > 0, 1.0 / np.sqrt(np.maximum(deg, 1e-12)), 0.0)
    return (dinv[:, None] * a * dinv[None, :]).astype(np.float32)


def bilinear_weight_matrix(out_size, in_size):
    """1-D row-interp matrix for F.interpolate(bilinear, align_corners=False)."""
    w = np.zeros((out_size, in_size), np.float32)
    scale = in_size / out_size
    for i in range(out_size):
        src = max((i + 0.5) * scale - 0.5, 0.0)
        i0 = min(int(np.floor(src)), in_size - 1)
        i1 = min(i0 + 1, in_size - 1)
        lam = src - i0
        w[i, i0] += 1.0 - lam
        w[i, i1] += lam
    return w


def select_interp_matrix(batch, max_num_nodes, num_graphs, n_pad, w_interp):
    """P[b] = W_interp @ Gather_b : folds to_dense_batch + bilinear rows into
    one (R, n_pad) matrix per graph.  Columns for padded node slots are zero —
    this invariant keeps padded rows (which see ReLU(bias)) out of the output."""
    batch = np.asarray(batch)
    n = batch.shape[0]
    pos = np.zeros(n, np.int64)
    for g in range(num_graphs):
        idx = np.nonzero(batch == g)[0]
        pos[idx] = np.arange(idx.size)
    gmat = np.zeros((num_graphs, max_num_nodes, n_pad), np.float32)
    gmat[batch, pos, np.arange(n)] = 1.0
    return np.einsum("rm,bmn->brn", w_interp, gmat).astype(np.float32)


def glorot(key, shape):
    fan_in, fan_out = shape
    limit = np.sqrt(6.0 / (fan_in + fan_out))
    return jax.random.uniform(key, shape, jnp.float32, -limit, limit)


def ring_edges(sizes):
    """Symmetric ring graph per component; returns edge_index [2, E]."""
    edges = []
    off = 0
    for s in sizes:
        for k in range(s):
            a = off + k
            b = off + (k + 1) % s
            edges.append((a, b))
            edges.append((b, a))
        off += s
    return np.array(edges, np.int64).T


# --------------------------------- main --------------------------------------

if __name__ == "__main__":
    key = jax.random.PRNGKey(0)
    in_channels = 4
    reshape = 10  # GNNLayers(in_channels=4, reshape=10)

    # Graph pair: "i" side has graphs of 5 and 7 nodes, "j" side 6 and 4 nodes.
    sizes_i = [5, 7]
    sizes_j = [6, 4]
    batch_i = np.concatenate([np.full(s, g, np.int64) for g, s in enumerate(sizes_i)])
    batch_j = np.concatenate([np.full(s, g, np.int64) for g, s in enumerate(sizes_j)])
    edge_index_i = ring_edges(sizes_i)   # [2, 24]
    edge_index_j = ring_edges(sizes_j)   # [2, 20]

    ni, nj = len(batch_i), len(batch_j)          # 12, 10
    n_pad = max(ni, nj)                          # 12
    num_graphs = int(max(batch_i.max(), batch_j.max()) + 1)   # 2

    k_xi, k_xj, k_w1, k_w2, k_w3 = jax.random.split(key, 5)
    x_i = np.asarray(jax.random.normal(k_xi, (ni, in_channels), jnp.float32))
    x_j = np.asarray(jax.random.normal(k_xj, (nj, in_channels), jnp.float32))

    # GCNConv params (glorot weights, zero bias — PyG defaults), shared by both sides.
    w1 = glorot(k_w1, (in_channels, 64)); b1 = jnp.zeros((64,), jnp.float32)
    w2 = glorot(k_w2, (64, 32));          b2 = jnp.zeros((32,), jnp.float32)
    w3 = glorot(k_w3, (32, 16));          b3 = jnp.zeros((16,), jnp.float32)

    a_i = normalized_adjacency(edge_index_i, ni)
    a_j = normalized_adjacency(edge_index_j, nj)

    # Pad both sides to a common node count and stack.
    a_stack = np.zeros((2, n_pad, n_pad), np.float32)
    a_stack[0, :ni, :ni] = a_i
    a_stack[1, :nj, :nj] = a_j
    x_stack = np.zeros((2, n_pad, in_channels), np.float32)
    x_stack[0, :ni] = x_i
    x_stack[1, :nj] = x_j

    # max_num_nodes = max(scatter_sum(ones, batch).max()) over both sides
    max_num_nodes = int(max(np.bincount(batch_i).max(), np.bincount(batch_j).max()))  # 7
    w_interp = bilinear_weight_matrix(reshape, max_num_nodes)                         # (R, M)

    # Fold densification + bilinear resize into per-graph matrices (host, once).
    ps = select_interp_matrix(batch_i, max_num_nodes, num_graphs, n_pad, w_interp)    # (B, R, Np)
    pt = select_interp_matrix(batch_j, max_num_nodes, num_graphs, n_pad, w_interp)    # (B, R, Np)

    params = (w1, b1, w2, b2, w3, b3)
    bb = pick_batch_block(num_graphs)
    fwd = jax.jit(functools.partial(gnn_layers_forward, batch_block=bb))
    x_1, x_2, x_3 = fwd(jnp.asarray(a_stack), jnp.asarray(x_stack), params,
                        jnp.asarray(ps), jnp.asarray(pt))
    jax.block_until_ready((x_1, x_2, x_3))

    assert x_1.shape == (num_graphs, 1, reshape, reshape)
    assert x_2.shape == (num_graphs, 1, reshape, reshape)
    assert x_3.shape == (num_graphs, 1, reshape, reshape)

    # ---------------- numpy reference check (matches torch semantics) --------
    w1n, w2n, w3n = np.asarray(w1), np.asarray(w2), np.asarray(w3)
    b1n, b2n, b3n = np.asarray(b1), np.asarray(b2), np.asarray(b3)

    def ref_stack(a, x):
        h1 = np.maximum(a @ (x @ w1n) + b1n, 0.0)
        h2 = np.maximum(a @ (h1 @ w2n) + b2n, 0.0)
        h3 = np.maximum(a @ (h2 @ w3n) + b3n, 0.0)
        return h1, h2, h3

    def ref_dense(x, batch):
        d = np.zeros((num_graphs, max_num_nodes, x.shape[1]), np.float32)
        cnt = np.zeros(num_graphs, np.int64)
        for i in range(x.shape[0]):
            g = int(batch[i]); d[g, cnt[g]] = x[i]; cnt[g] += 1
        return d

    hs_ref = ref_stack(a_i, x_i)
    ht_ref = ref_stack(a_j, x_j)
    for got, xs, xt in zip((x_1, x_2, x_3), hs_ref, ht_ref):
        xsd = ref_dense(xs, batch_i)
        xtd = ref_dense(xt, batch_j)
        s = np.einsum("bmf,bnf->bmn", xsd, xtd)
        want = np.einsum("rm,bmn,sn->brs", w_interp, s, w_interp)[:, None]
        assert np.allclose(np.asarray(got), want, rtol=2e-3, atol=2e-3), \
            "mismatch vs reference"

    print("KERNEL_OK")
</pallas_src>

<mosaic_0001>
module attributes {stable_mosaic.version = 11 : i64} {
  func.func @gnn_fused_kernel(%arg0: i32, %arg1: memref<2x12x12xf32, #tpu.memory_space<vmem>>, %arg2: memref<2x12x4xf32, #tpu.memory_space<vmem>>, %arg3: memref<4x64xf32, #tpu.memory_space<vmem>>, %arg4: memref<1x64xf32, #tpu.memory_space<vmem>>, %arg5: memref<64x32xf32, #tpu.memory_space<vmem>>, %arg6: memref<1x32xf32, #tpu.memory_space<vmem>>, %arg7: memref<32x16xf32, #tpu.memory_space<vmem>>, %arg8: memref<1x16xf32, #tpu.memory_space<vmem>>, %arg9: memref<2x10x12xf32, #tpu.memory_space<vmem>>, %arg10: memref<2x10x12xf32, #tpu.memory_space<vmem>>, %arg11: memref<2x3x10x10xf32, #tpu.memory_space<vmem>>) attributes {dimension_semantics = [#tpu.dimension_semantics<parallel>], iteration_bounds = array<i64: 1>, scalar_prefetch = 0 : i64, scratch_operands = 0 : i64, tpu.core_type = #tpu.core_type<tc>, window_params = [{pipeline_mode = #tpu.pipeline_mode<synchronous>, transform_indices = @transform_0, window_bounds = array<i64: 2, 12, 12>}, {pipeline_mode = #tpu.pipeline_mode<synchronous>, transform_indices = @transform_1, window_bounds = array<i64: 2, 12, 4>}, {pipeline_mode = #tpu.pipeline_mode<synchronous>, transform_indices = @transform_2, window_bounds = array<i64: 4, 64>}, {pipeline_mode = #tpu.pipeline_mode<synchronous>, transform_indices = @transform_3, window_bounds = array<i64: 1, 64>}, {pipeline_mode = #tpu.pipeline_mode<synchronous>, transform_indices = @transform_4, window_bounds = array<i64: 64, 32>}, {pipeline_mode = #tpu.pipeline_mode<synchronous>, transform_indices = @transform_5, window_bounds = array<i64: 1, 32>}, {pipeline_mode = #tpu.pipeline_mode<synchronous>, transform_indices = @transform_6, window_bounds = array<i64: 32, 16>}, {pipeline_mode = #tpu.pipeline_mode<synchronous>, transform_indices = @transform_7, window_bounds = array<i64: 1, 16>}, {transform_indices = @transform_8, window_bounds = array<i64: 2, 10, 12>}, {transform_indices = @transform_9, window_bounds = array<i64: 2, 10, 12>}, {transform_indices = @transform_10, window_bounds = array<i64: 2, 3, 10, 10>}]} {
    %c0 = arith.constant 0 : index
    %c0_0 = arith.constant 0 : index
    %0 = vector.load %arg3[%c0, %c0_0] : memref<4x64xf32, #tpu.memory_space<vmem>>, vector<4x64xf32>
    %c0_1 = arith.constant 0 : index
    %c0_2 = arith.constant 0 : index
    %1 = vector.load %arg5[%c0_1, %c0_2] : memref<64x32xf32, #tpu.memory_space<vmem>>, vector<64x32xf32>
    %c0_3 = arith.constant 0 : index
    %c0_4 = arith.constant 0 : index
    %2 = vector.load %arg7[%c0_3, %c0_4] : memref<32x16xf32, #tpu.memory_space<vmem>>, vector<32x16xf32>
    %c0_5 = arith.constant 0 : index
    %c0_6 = arith.constant 0 : index
    %3 = vector.load %arg4[%c0_5, %c0_6] : memref<1x64xf32, #tpu.memory_space<vmem>>, vector<1x64xf32>
    %c0_7 = arith.constant 0 : index
    %c0_8 = arith.constant 0 : index
    %4 = vector.load %arg6[%c0_7, %c0_8] : memref<1x32xf32, #tpu.memory_space<vmem>>, vector<1x32xf32>
    %c0_9 = arith.constant 0 : index
    %c0_10 = arith.constant 0 : index
    %5 = vector.load %arg8[%c0_9, %c0_10] : memref<1x16xf32, #tpu.memory_space<vmem>>, vector<1x16xf32>
    %c0_11 = arith.constant 0 : index
    %c0_12 = arith.constant 0 : index
    %c0_13 = arith.constant 0 : index
    %6 = vector.load %arg1[%c0_11, %c0_12, %c0_13] : memref<2x12x12xf32, #tpu.memory_space<vmem>>, vector<1x12x12xf32>
    %7 = vector.shape_cast %6 : vector<1x12x12xf32> to vector<12x12xf32>
    %c0_14 = arith.constant 0 : index
    %c0_15 = arith.constant 0 : index
    %c0_16 = arith.constant 0 : index
    %8 = vector.load %arg2[%c0_14, %c0_15, %c0_16] : memref<2x12x4xf32, #tpu.memory_space<vmem>>, vector<1x12x4xf32>
    %9 = vector.shape_cast %8 : vector<1x12x4xf32> to vector<12x4xf32>
    %cst = arith.constant dense<0.000000e+00> : vector<12x4xf32>
    %10 = tpu.matmul %7, %9, %cst {dimension_numbers = #tpu.dot_dimension_numbers<[1], [0], [0], [1], [0, 0, 1, 1], [], []>} : vector<12x12xf32>, vector<12x4xf32>, vector<12x4xf32> -> vector<12x4xf32>
    %cst_17 = arith.constant dense<0.000000e+00> : vector<12x64xf32>
    %11 = tpu.matmul %10, %0, %cst_17 {dimension_numbers = #tpu.dot_dimension_numbers<[1], [0], [0], [1], [0, 0, 1, 1], [], []>} : vector<12x4xf32>, vector<4x64xf32>, vector<12x64xf32> -> vector<12x64xf32>
    %12 = vector.broadcast %3 : vector<1x64xf32> to vector<12x64xf32>
    %13 = arith.addf %11, %12 : vector<12x64xf32>
    %cst_18 = arith.constant 0.000000e+00 : f32
    %14 = vector.broadcast %cst_18 : f32 to vector<12x64xf32>
    %15 = arith.maximumf %13, %14 : vector<12x64xf32>
    %cst_19 = arith.constant dense<0.000000e+00> : vector<12x32xf32>
    %16 = tpu.matmul %15, %1, %cst_19 {dimension_numbers = #tpu.dot_dimension_numbers<[1], [0], [0], [1], [0, 0, 1, 1], [], []>} : vector<12x64xf32>, vector<64x32xf32>, vector<12x32xf32> -> vector<12x32xf32>
    %cst_20 = arith.constant dense<0.000000e+00> : vector<12x32xf32>
    %17 = tpu.matmul %7, %16, %cst_20 {dimension_numbers = #tpu.dot_dimension_numbers<[1], [0], [0], [1], [0, 0, 1, 1], [], []>} : vector<12x12xf32>, vector<12x32xf32>, vector<12x32xf32> -> vector<12x32xf32>
    %18 = vector.broadcast %4 : vector<1x32xf32> to vector<12x32xf32>
    %19 = arith.addf %17, %18 : vector<12x32xf32>
    %cst_21 = arith.constant 0.000000e+00 : f32
    %20 = vector.broadcast %cst_21 : f32 to vector<12x32xf32>
    %21 = arith.maximumf %19, %20 : vector<12x32xf32>
    %cst_22 = arith.constant dense<0.000000e+00> : vector<12x16xf32>
    %22 = tpu.matmul %21, %2, %cst_22 {dimension_numbers = #tpu.dot_dimension_numbers<[1], [0], [0], [1], [0, 0, 1, 1], [], []>} : vector<12x32xf32>, vector<32x16xf32>, vector<12x16xf32> -> vector<12x16xf32>
    %cst_23 = arith.constant dense<0.000000e+00> : vector<12x16xf32>
    %23 = tpu.matmul %7, %22, %cst_23 {dimension_numbers = #tpu.dot_dimension_numbers<[1], [0], [0], [1], [0, 0, 1, 1], [], []>} : vector<12x12xf32>, vector<12x16xf32>, vector<12x16xf32> -> vector<12x16xf32>
    %24 = vector.broadcast %5 : vector<1x16xf32> to vector<12x16xf32>
    %25 = arith.addf %23, %24 : vector<12x16xf32>
    %cst_24 = arith.constant 0.000000e+00 : f32
    %26 = vector.broadcast %cst_24 : f32 to vector<12x16xf32>
    %27 = arith.maximumf %25, %26 : vector<12x16xf32>
    %c1 = arith.constant 1 : index
    %c0_25 = arith.constant 0 : index
    %c0_26 = arith.constant 0 : index
    %28 = vector.load %arg1[%c1, %c0_25, %c0_26] : memref<2x12x12xf32, #tpu.memory_space<vmem>>, vector<1x12x12xf32>
    %29 = vector.shape_cast %28 : vector<1x12x12xf32> to vector<12x12xf32>
    %c1_27 = arith.constant 1 : index
    %c0_28 = arith.constant 0 : index
    %c0_29 = arith.constant 0 : index
    %30 = vector.load %arg2[%c1_27, %c0_28, %c0_29] : memref<2x12x4xf32, #tpu.memory_space<vmem>>, vector<1x12x4xf32>
    %31 = vector.shape_cast %30 : vector<1x12x4xf32> to vector<12x4xf32>
    %cst_30 = arith.constant dense<0.000000e+00> : vector<12x4xf32>
    %32 = tpu.matmul %29, %31, %cst_30 {dimension_numbers = #tpu.dot_dimension_numbers<[1], [0], [0], [1], [0, 0, 1, 1], [], []>} : vector<12x12xf32>, vector<12x4xf32>, vector<12x4xf32> -> vector<12x4xf32>
    %cst_31 = arith.constant dense<0.000000e+00> : vector<12x64xf32>
    %33 = tpu.matmul %32, %0, %cst_31 {dimension_numbers = #tpu.dot_dimension_numbers<[1], [0], [0], [1], [0, 0, 1, 1], [], []>} : vector<12x4xf32>, vector<4x64xf32>, vector<12x64xf32> -> vector<12x64xf32>
    %34 = vector.broadcast %3 : vector<1x64xf32> to vector<12x64xf32>
    %35 = arith.addf %33, %34 : vector<12x64xf32>
    %cst_32 = arith.constant 0.000000e+00 : f32
    %36 = vector.broadcast %cst_32 : f32 to vector<12x64xf32>
    %37 = arith.maximumf %35, %36 : vector<12x64xf32>
    %cst_33 = arith.constant dense<0.000000e+00> : vector<12x32xf32>
    %38 = tpu.matmul %37, %1, %cst_33 {dimension_numbers = #tpu.dot_dimension_numbers<[1], [0], [0], [1], [0, 0, 1, 1], [], []>} : vector<12x64xf32>, vector<64x32xf32>, vector<12x32xf32> -> vector<12x32xf32>
    %cst_34 = arith.constant dense<0.000000e+00> : vector<12x32xf32>
    %39 = tpu.matmul %29, %38, %cst_34 {dimension_numbers = #tpu.dot_dimension_numbers<[1], [0], [0], [1], [0, 0, 1, 1], [], []>} : vector<12x12xf32>, vector<12x32xf32>, vector<12x32xf32> -> vector<12x32xf32>
    %40 = vector.broadcast %4 : vector<1x32xf32> to vector<12x32xf32>
    %41 = arith.addf %39, %40 : vector<12x32xf32>
    %cst_35 = arith.constant 0.000000e+00 : f32
    %42 = vector.broadcast %cst_35 : f32 to vector<12x32xf32>
    %43 = arith.maximumf %41, %42 : vector<12x32xf32>
    %cst_36 = arith.constant dense<0.000000e+00> : vector<12x16xf32>
    %44 = tpu.matmul %43, %2, %cst_36 {dimension_numbers = #tpu.dot_dimension_numbers<[1], [0], [0], [1], [0, 0, 1, 1], [], []>} : vector<12x32xf32>, vector<32x16xf32>, vector<12x16xf32> -> vector<12x16xf32>
    %cst_37 = arith.constant dense<0.000000e+00> : vector<12x16xf32>
    %45 = tpu.matmul %29, %44, %cst_37 {dimension_numbers = #tpu.dot_dimension_numbers<[1], [0], [0], [1], [0, 0, 1, 1], [], []>} : vector<12x12xf32>, vector<12x16xf32>, vector<12x16xf32> -> vector<12x16xf32>
    %46 = vector.broadcast %5 : vector<1x16xf32> to vector<12x16xf32>
    %47 = arith.addf %45, %46 : vector<12x16xf32>
    %cst_38 = arith.constant 0.000000e+00 : f32
    %48 = vector.broadcast %cst_38 : f32 to vector<12x16xf32>
    %49 = arith.maximumf %47, %48 : vector<12x16xf32>
    %c0_39 = arith.constant 0 : index
    %c0_40 = arith.constant 0 : index
    %c0_41 = arith.constant 0 : index
    %50 = vector.load %arg9[%c0_39, %c0_40, %c0_41] : memref<2x10x12xf32, #tpu.memory_space<vmem>>, vector<1x10x12xf32>
    %51 = vector.shape_cast %50 : vector<1x10x12xf32> to vector<10x12xf32>
    %c0_42 = arith.constant 0 : index
    %c0_43 = arith.constant 0 : index
    %c0_44 = arith.constant 0 : index
    %52 = vector.load %arg10[%c0_42, %c0_43, %c0_44] : memref<2x10x12xf32, #tpu.memory_space<vmem>>, vector<1x10x12xf32>
    %53 = vector.shape_cast %52 : vector<1x10x12xf32> to vector<10x12xf32>
    %cst_45 = arith.constant dense<0.000000e+00> : vector<10x64xf32>
    %54 = tpu.matmul %51, %15, %cst_45 {dimension_numbers = #tpu.dot_dimension_numbers<[1], [0], [0], [1], [0, 0, 1, 1], [], []>} : vector<10x12xf32>, vector<12x64xf32>, vector<10x64xf32> -> vector<10x64xf32>
    %cst_46 = arith.constant dense<0.000000e+00> : vector<10x64xf32>
    %55 = tpu.matmul %53, %37, %cst_46 {dimension_numbers = #tpu.dot_dimension_numbers<[1], [0], [0], [1], [0, 0, 1, 1], [], []>} : vector<10x12xf32>, vector<12x64xf32>, vector<10x64xf32> -> vector<10x64xf32>
    %cst_47 = arith.constant dense<0.000000e+00> : vector<10x10xf32>
    %56 = tpu.matmul %54, %55, %cst_47 {dimension_numbers = #tpu.dot_dimension_numbers<[1], [1], [0], [0], [0, 0, 1, 0], [], []>} : vector<10x64xf32>, vector<10x64xf32>, vector<10x10xf32> -> vector<10x10xf32>
    %c0_48 = arith.constant 0 : index
    %c0_49 = arith.constant 0 : index
    %c0_50 = arith.constant 0 : index
    %c0_51 = arith.constant 0 : index
    %57 = vector.load %arg11[%c0_48, %c0_49, %c0_50, %c0_51] : memref<2x3x10x10xf32, #tpu.memory_space<vmem>>, vector<1x1x10x10xf32>
    %58 = vector.shape_cast %57 : vector<1x1x10x10xf32> to vector<10x10xf32>
    %59 = vector.shape_cast %56 : vector<10x10xf32> to vector<1x1x10x10xf32>
    tpu.vector_store %arg11[%c0_48, %c0_49, %c0_50, %c0_51], %59 {strides = array<i32>} : memref<2x3x10x10xf32, #tpu.memory_space<vmem>>, vector<1x1x10x10xf32>,
    %cst_52 = arith.constant dense<0.000000e+00> : vector<10x32xf32>
    %60 = tpu.matmul %51, %21, %cst_52 {dimension_numbers = #tpu.dot_dimension_numbers<[1], [0], [0], [1], [0, 0, 1, 1], [], []>} : vector<10x12xf32>, vector<12x32xf32>, vector<10x32xf32> -> vector<10x32xf32>
    %cst_53 = arith.constant dense<0.000000e+00> : vector<10x32xf32>
    %61 = tpu.matmul %53, %43, %cst_53 {dimension_numbers = #tpu.dot_dimension_numbers<[1], [0], [0], [1], [0, 0, 1, 1], [], []>} : vector<10x12xf32>, vector<12x32xf32>, vector<10x32xf32> -> vector<10x32xf32>
    %cst_54 = arith.constant dense<0.000000e+00> : vector<10x10xf32>
    %62 = tpu.matmul %60, %61, %cst_54 {dimension_numbers = #tpu.dot_dimension_numbers<[1], [1], [0], [0], [0, 0, 1, 0], [], []>} : vector<10x32xf32>, vector<10x32xf32>, vector<10x10xf32> -> vector<10x10xf32>
    %c0_55 = arith.constant 0 : index
    %c1_56 = arith.constant 1 : index
    %c0_57 = arith.constant 0 : index
    %c0_58 = arith.constant 0 : index
    %63 = vector.load %arg11[%c0_55, %c1_56, %c0_57, %c0_58] : memref<2x3x10x10xf32, #tpu.memory_space<vmem>>, vector<1x1x10x10xf32>
    %64 = vector.shape_cast %63 : vector<1x1x10x10xf32> to vector<10x10xf32>
    %65 = vector.shape_cast %62 : vector<10x10xf32> to vector<1x1x10x10xf32>
    tpu.vector_store %arg11[%c0_55, %c1_56, %c0_57, %c0_58], %65 {strides = array<i32>} : memref<2x3x10x10xf32, #tpu.memory_space<vmem>>, vector<1x1x10x10xf32>,
    %cst_59 = arith.constant dense<0.000000e+00> : vector<10x16xf32>
    %66 = tpu.matmul %51, %27, %cst_59 {dimension_numbers = #tpu.dot_dimension_numbers<[1], [0], [0], [1], [0, 0, 1, 1], [], []>} : vector<10x12xf32>, vector<12x16xf32>, vector<10x16xf32> -> vector<10x16xf32>
    %cst_60 = arith.constant dense<0.000000e+00> : vector<10x16xf32>
    %67 = tpu.matmul %53, %49, %cst_60 {dimension_numbers = #tpu.dot_dimension_numbers<[1], [0], [0], [1], [0, 0, 1, 1], [], []>} : vector<10x12xf32>, vector<12x16xf32>, vector<10x16xf32> -> vector<10x16xf32>
    %cst_61 = arith.constant dense<0.000000e+00> : vector<10x10xf32>
    %68 = tpu.matmul %66, %67, %cst_61 {dimension_numbers = #tpu.dot_dimension_numbers<[1], [1], [0], [0], [0, 0, 1, 0], [], []>} : vector<10x16xf32>, vector<10x16xf32>, vector<10x10xf32> -> vector<10x10xf32>
    %c0_62 = arith.constant 0 : index
    %c2 = arith.constant 2 : index
    %c0_63 = arith.constant 0 : index
    %c0_64 = arith.constant 0 : index
    %69 = vector.load %arg11[%c0_62, %c2, %c0_63, %c0_64] : memref<2x3x10x10xf32, #tpu.memory_space<vmem>>, vector<1x1x10x10xf32>
    %70 = vector.shape_cast %69 : vector<1x1x10x10xf32> to vector<10x10xf32>
    %71 = vector.shape_cast %68 : vector<10x10xf32> to vector<1x1x10x10xf32>
    tpu.vector_store %arg11[%c0_62, %c2, %c0_63, %c0_64], %71 {strides = array<i32>} : memref<2x3x10x10xf32, #tpu.memory_space<vmem>>, vector<1x1x10x10xf32>,
    %c1_65 = arith.constant 1 : index
    %c0_66 = arith.constant 0 : index
    %c0_67 = arith.constant 0 : index
    %72 = vector.load %arg9[%c1_65, %c0_66, %c0_67] : memref<2x10x12xf32, #tpu.memory_space<vmem>>, vector<1x10x12xf32>
    %73 = vector.shape_cast %72 : vector<1x10x12xf32> to vector<10x12xf32>
    %c1_68 = arith.constant 1 : index
    %c0_69 = arith.constant 0 : index
    %c0_70 = arith.constant 0 : index
    %74 = vector.load %arg10[%c1_68, %c0_69, %c0_70] : memref<2x10x12xf32, #tpu.memory_space<vmem>>, vector<1x10x12xf32>
    %75 = vector.shape_cast %74 : vector<1x10x12xf32> to vector<10x12xf32>
    %cst_71 = arith.constant dense<0.000000e+00> : vector<10x64xf32>
    %76 = tpu.matmul %73, %15, %cst_71 {dimension_numbers = #tpu.dot_dimension_numbers<[1], [0], [0], [1], [0, 0, 1, 1], [], []>} : vector<10x12xf32>, vector<12x64xf32>, vector<10x64xf32> -> vector<10x64xf32>
    %cst_72 = arith.constant dense<0.000000e+00> : vector<10x64xf32>
    %77 = tpu.matmul %75, %37, %cst_72 {dimension_numbers = #tpu.dot_dimension_numbers<[1], [0], [0], [1], [0, 0, 1, 1], [], []>} : vector<10x12xf32>, vector<12x64xf32>, vector<10x64xf32> -> vector<10x64xf32>
    %cst_73 = arith.constant dense<0.000000e+00> : vector<10x10xf32>
    %78 = tpu.matmul %76, %77, %cst_73 {dimension_numbers = #tpu.dot_dimension_numbers<[1], [1], [0], [0], [0, 0, 1, 0], [], []>} : vector<10x64xf32>, vector<10x64xf32>, vector<10x10xf32> -> vector<10x10xf32>
    %c1_74 = arith.constant 1 : index
    %c0_75 = arith.constant 0 : index
    %c0_76 = arith.constant 0 : index
    %c0_77 = arith.constant 0 : index
    %79 = vector.load %arg11[%c1_74, %c0_75, %c0_76, %c0_77] : memref<2x3x10x10xf32, #tpu.memory_space<vmem>>, vector<1x1x10x10xf32>
    %80 = vector.shape_cast %79 : vector<1x1x10x10xf32> to vector<10x10xf32>
    %81 = vector.shape_cast %78 : vector<10x10xf32> to vector<1x1x10x10xf32>
    tpu.vector_store %arg11[%c1_74, %c0_75, %c0_76, %c0_77], %81 {strides = array<i32>} : memref<2x3x10x10xf32, #tpu.memory_space<vmem>>, vector<1x1x10x10xf32>,
    %cst_78 = arith.constant dense<0.000000e+00> : vector<10x32xf32>
    %82 = tpu.matmul %73, %21, %cst_78 {dimension_numbers = #tpu.dot_dimension_numbers<[1], [0], [0], [1], [0, 0, 1, 1], [], []>} : vector<10x12xf32>, vector<12x32xf32>, vector<10x32xf32> -> vector<10x32xf32>
    %cst_79 = arith.constant dense<0.000000e+00> : vector<10x32xf32>
    %83 = tpu.matmul %75, %43, %cst_79 {dimension_numbers = #tpu.dot_dimension_numbers<[1], [0], [0], [1], [0, 0, 1, 1], [], []>} : vector<10x12xf32>, vector<12x32xf32>, vector<10x32xf32> -> vector<10x32xf32>
    %cst_80 = arith.constant dense<0.000000e+00> : vector<10x10xf32>
    %84 = tpu.matmul %82, %83, %cst_80 {dimension_numbers = #tpu.dot_dimension_numbers<[1], [1], [0], [0], [0, 0, 1, 0], [], []>} : vector<10x32xf32>, vector<10x32xf32>, vector<10x10xf32> -> vector<10x10xf32>
    %c1_81 = arith.constant 1 : index
    %c1_82 = arith.constant 1 : index
    %c0_83 = arith.constant 0 : index
    %c0_84 = arith.constant 0 : index
    %85 = vector.load %arg11[%c1_81, %c1_82, %c0_83, %c0_84] : memref<2x3x10x10xf32, #tpu.memory_space<vmem>>, vector<1x1x10x10xf32>
    %86 = vector.shape_cast %85 : vector<1x1x10x10xf32> to vector<10x10xf32>
    %87 = vector.shape_cast %84 : vector<10x10xf32> to vector<1x1x10x10xf32>
    tpu.vector_store %arg11[%c1_81, %c1_82, %c0_83, %c0_84], %87 {strides = array<i32>} : memref<2x3x10x10xf32, #tpu.memory_space<vmem>>, vector<1x1x10x10xf32>,
    %cst_85 = arith.constant dense<0.000000e+00> : vector<10x16xf32>
    %88 = tpu.matmul %73, %27, %cst_85 {dimension_numbers = #tpu.dot_dimension_numbers<[1], [0], [0], [1], [0, 0, 1, 1], [], []>} : vector<10x12xf32>, vector<12x16xf32>, vector<10x16xf32> -> vector<10x16xf32>
    %cst_86 = arith.constant dense<0.000000e+00> : vector<10x16xf32>
    %89 = tpu.matmul %75, %49, %cst_86 {dimension_numbers = #tpu.dot_dimension_numbers<[1], [0], [0], [1], [0, 0, 1, 1], [], []>} : vector<10x12xf32>, vector<12x16xf32>, vector<10x16xf32> -> vector<10x16xf32>
    %cst_87 = arith.constant dense<0.000000e+00> : vector<10x10xf32>
    %90 = tpu.matmul %88, %89, %cst_87 {dimension_numbers = #tpu.dot_dimension_numbers<[1], [1], [0], [0], [0, 0, 1, 0], [], []>} : vector<10x16xf32>, vector<10x16xf32>, vector<10x10xf32> -> vector<10x10xf32>
    %c1_88 = arith.constant 1 : index
    %c2_89 = arith.constant 2 : index
    %c0_90 = arith.constant 0 : index
    %c0_91 = arith.constant 0 : index
    %91 = vector.load %arg11[%c1_88, %c2_89, %c0_90, %c0_91] : memref<2x3x10x10xf32, #tpu.memory_space<vmem>>, vector<1x1x10x10xf32>
    %92 = vector.shape_cast %91 : vector<1x1x10x10xf32> to vector<10x10xf32>
    %93 = vector.shape_cast %90 : vector<10x10xf32> to vector<1x1x10x10xf32>
    tpu.vector_store %arg11[%c1_88, %c2_89, %c0_90, %c0_91], %93 {strides = array<i32>} : memref<2x3x10x10xf32, #tpu.memory_space<vmem>>, vector<1x1x10x10xf32>,
    return
  }
  func.func @transform_0(%arg0: i32) -> (i32, i32, i32) {
    %c0_i32 = arith.constant 0 : i32
    %c0_i32_0 = arith.constant 0 : i32
    %c0_i32_1 = arith.constant 0 : i32
    %c0_i32_2 = arith.constant 0 : i32
    return %c0_i32, %c0_i32_0, %c0_i32_1 : i32, i32, i32
  }
  func.func @transform_1(%arg0: i32) -> (i32, i32, i32) {
    %c0_i32 = arith.constant 0 : i32
    %c0_i32_0 = arith.constant 0 : i32
    %c0_i32_1 = arith.constant 0 : i32
    %c0_i32_2 = arith.constant 0 : i32
    return %c0_i32, %c0_i32_0, %c0_i32_1 : i32, i32, i32
  }
  func.func @transform_2(%arg0: i32) -> (i32, i32) {
    %c0_i32 = arith.constant 0 : i32
    %c0_i32_0 = arith.constant 0 : i32
    %c0_i32_1 = arith.constant 0 : i32
    return %c0_i32, %c0_i32_0 : i32, i32
  }
  func.func @transform_3(%arg0: i32) -> (i32, i32) {
    %c0_i32 = arith.constant 0 : i32
    %c0_i32_0 = arith.constant 0 : i32
    %c0_i32_1 = arith.constant 0 : i32
    return %c0_i32, %c0_i32_0 : i32, i32
  }
  func.func @transform_4(%arg0: i32) -> (i32, i32) {
    %c0_i32 = arith.constant 0 : i32
    %c0_i32_0 = arith.constant 0 : i32
    %c0_i32_1 = arith.constant 0 : i32
    return %c0_i32, %c0_i32_0 : i32, i32
  }
  func.func @transform_5(%arg0: i32) -> (i32, i32) {
    %c0_i32 = arith.constant 0 : i32
    %c0_i32_0 = arith.constant 0 : i32
    %c0_i32_1 = arith.constant 0 : i32
    return %c0_i32, %c0_i32_0 : i32, i32
  }
  func.func @transform_6(%arg0: i32) -> (i32, i32) {
    %c0_i32 = arith.constant 0 : i32
    %c0_i32_0 = arith.constant 0 : i32
    %c0_i32_1 = arith.constant 0 : i32
    return %c0_i32, %c0_i32_0 : i32, i32
  }
  func.func @transform_7(%arg0: i32) -> (i32, i32) {
    %c0_i32 = arith.constant 0 : i32
    %c0_i32_0 = arith.constant 0 : i32
    %c0_i32_1 = arith.constant 0 : i32
    return %c0_i32, %c0_i32_0 : i32, i32
  }
  func.func @transform_8(%arg0: i32) -> (i32, i32, i32) {
    %c0_i32 = arith.constant 0 : i32
    %c0_i32_0 = arith.constant 0 : i32
    %c0_i32_1 = arith.constant 0 : i32
    return %arg0, %c0_i32, %c0_i32_0 : i32, i32, i32
  }
  func.func @transform_9(%arg0: i32) -> (i32, i32, i32) {
    %c0_i32 = arith.constant 0 : i32
    %c0_i32_0 = arith.constant 0 : i32
    %c0_i32_1 = arith.constant 0 : i32
    return %arg0, %c0_i32, %c0_i32_0 : i32, i32, i32
  }
  func.func @transform_10(%arg0: i32) -> (i32, i32, i32, i32) {
    %c0_i32 = arith.constant 0 : i32
    %c0_i32_0 = arith.constant 0 : i32
    %c0_i32_1 = arith.constant 0 : i32
    %c0_i32_2 = arith.constant 0 : i32
    return %arg0, %c0_i32, %c0_i32_0, %c0_i32_1 : i32, i32, i32, i32
  }
}

</mosaic_0001>

<bundles_post_ra>
// kernel: gnn_layers_forward.1
= control target key start
LH: loop header
LB: loop body
LE: loop exit
PB: predicated region body
PF: predicated region fallthrough
CT: control target
= control target key end

     0   :  { %vm62_vm0 = vcmask 1043456   ;;  %vm55_vm1 = vcmask 97280   ;;  %vm3237_vm2 = vmmov 1   ;;  %vm147_vm4 = vcmask 31744   ;;  %s3694_s1 = inlined_call_operand.vmem [shape: f32[2,12,4], index: 1, kind: input, shape index: {}]   ;;  %s3695_s0 = inlined_call_operand.vmem [shape: f32[2,12,12], index: 0, kind: input, shape index: {}]   ;;  %s3696_s2 = inlined_call_operand.vmem [shape: f32[4,64], index: 2, kind: input, shape index: {}]   ;;  %s3697_s4 = inlined_call_operand.vmem [shape: f32[64,32], index: 4, kind: input, shape index: {}]   ;;  %s3698_s3 = inlined_call_operand.vmem [shape: f32[1,64], index: 3, kind: input, shape index: {}]   ;;  %s3699_s6 = inlined_call_operand.vmem [shape: f32[32,16], index: 6, kind: input, shape index: {}]   ;;  %s3700_s5 = inlined_call_operand.vmem [shape: f32[1,32], index: 5, kind: input, shape index: {}]   ;;  %s3701_s7 = inlined_call_operand.vmem [shape: f32[1,16], index: 7, kind: input, shape index: {}]   ;;  %s3702_s8 = inlined_call_operand.vmem [shape: f32[2,10,12], index: 8, kind: input, shape index: {}]   ;;  %s3703_s9 = inlined_call_operand.vmem [shape: f32[2,10,12], index: 9, kind: input, shape index: {}]   ;;  %s3704_s10 = inlined_call_operand.vmem [shape: f32[2,3,10,10], index: 10, kind: output, shape index: {}]  }
   0x1   :  { %v53_v0 = vld [vmem:[%s3694_s1] sm:$0xff]  ;;  %v54_v1 = vld [vmem:[%s3694_s1 + $0x8] sm:$0xf]  ;;  %vm3300_vm3 = vmpackc.low %vm62_vm0, %vm3237_vm2  ;;  %vm234_vm5 = vcmask 523264   ;;  %vm402_vm6 = vcmask 261120   ;;  %vm1726_vm9 = vcmask 130048  }
   0x2   :  { %v3044_v3 = vpack.c.bf16 %v54_v1, %v53_v0  ;;  %v3307_v4 = vld [vmem:[%s3695_s0] sm:$0xff]  ;;  %v3323_v6 = vld [vmem:[%s3695_s0 + $0x8] sm:$0xf]  ;;  %v38_v9 = vld [vmem:[%s3697_s4 + $0x10] sm:$0xff]  ;;  %vm1324_vm11 = vcmask 74752   ;;  %vm1322_vm12 = vcmask 80896  }
   0x3   :  { %2810 = vmatprep.mubr.msk.f32.mxu0 %vm55_vm1, %v3307_v4  ;;  %v3314_v5 = vld [vmem:[%s3696_s2] sm:$0xf]  ;;  %v37_v8 = vld [vmem:[%s3697_s4 + $0x8] sm:$0xff]  ;;  %v39_v11 = vld [vmem:[%s3697_s4 + $0x18] sm:$0xff] }
   0x4   :  { %3046 = vmatprep.subr.msk.bf16.mxu0 %vm3300_vm3, %v3044_v3  ;;  %v36_v7 = vld [vmem:[%s3697_s4] sm:$0xff]  ;;  %v3054_v12 = vpack.c.bf16 %v39_v11, %v38_v9  ;;  %v41_v14 = vld [vmem:[%s3697_s4 + $0x28] sm:$0xff]  ;;  %v42_v18 = vld [vmem:[%s3697_s4 + $0x30] sm:$0xff] }
   0x5   :  { %3049 = vmatpush3.bf16.msk.msra.mxu0 %vm3300_vm3, %v3044_v3  ;;  %v3050_v10 = vpack.c.bf16 %v37_v8, %v36_v7  ;;  %v40_v13 = vld [vmem:[%s3697_s4 + $0x20] sm:$0xff]  ;;  %v43_v19 = vld [vmem:[%s3697_s4 + $0x38] sm:$0xff]  ;;  %v2580_v21 = vld [vmem:[%s3694_s1 + $0x10] sm:$0xff] }
   0x6   :  { %2813 = vmatprep.subr.msk.mxu0 %vm62_vm0, %v3314_v5  ;;  %v3058_v15 = vpack.c.bf16 %v41_v14, %v40_v13  ;;  %v3062_v20 = vpack.c.bf16 %v43_v19, %v42_v18  ;;  %v2581_v22 = vld [vmem:[%s3694_s1 + $0x18] sm:$0xf]  ;;  %v3370_v24 = vld [vmem:[%s3698_s3] ss:$0 sm:$0xff]  ;;  %v3377_v31 = vld [vmem:[%s3695_s0 + $0x10] sm:$0xff] }
   0x7   :  { %3051 = vmatprep.subr.bf16.mxu1 %v3050_v10  ;;  %v3086_v23 = vpack.c.bf16 %v2581_v22, %v2580_v21  ;;  %v3390_v33 = vld [vmem:[%s3695_s0 + $0x18] sm:$0xf]  ;;  %v44_v34 = vld [vmem:[%s3699_s6] sm:$0xff]  ;;  %v45_v35 = vld [vmem:[%s3699_s6 + $0x8] sm:$0xff] }
   0x8   :  { %2811 = vmatmul.mubr.msk.f32.vlgmr.msra.gmra.mrb[0].mxu0 %vm55_vm1, %v3323_v6  ;;  %3053 = vmatpush3.bf16.msra.mxu1 %v3050_v10  ;;  %v3403_v39 = vpack.c.bf16 %v45_v35, %v44_v34  ;;  %v46_v40 = vld [vmem:[%s3699_s6 + $0x10] sm:$0xff]  ;;  %v47_v41 = vld [vmem:[%s3699_s6 + $0x18] sm:$0xff]  ;;  %v2568_v43 = vld [vmem:[%s3700_s5] ss:$0 sm:$0xff] }
   0x9   :  { %2814 = vmatpush3.msk.msra.mxu0 %vm62_vm0, %v3314_v5  ;;  %3055 = vmatprep.subr.bf16.mxu1 %v3054_v12  ;;  %v3076_v42 = vpack.c.bf16 %v47_v41, %v46_v40  ;;  %v3445_v56 = vld [vmem:[%s3701_s7] ss:$0 sm:$0xff]  ;;  %v1066_v19 = vld [vmem:[%s3702_s8 + $0x8] sm:$0x3]  ;;  %vm3532_vm7 = vmpackc.low %vm234_vm5, %vm234_vm5 }
   0xa   :  { %v1065_v18 = vld [vmem:[%s3702_s8] sm:$0xff]  ;;  %v2632_v41 = vld [vmem:[%s3702_s8 + $0x10] sm:$0xff]  ;;  %vm3560_vm8 = vmpackc.low %vm402_vm6, %vm402_vm6 }
   0xb   :  { %vm3619_vm10 = vmpackc.low %vm1726_vm9, %vm1726_vm9 }
   0xc   :  { %3057 = vmatpush3.bf16.msra.mxu1 %v3054_v12 }
   0xd   :  { %3059 = vmatprep.subr.bf16.mxu1 %v3058_v15 }
  0x10   :  { %3061 = vmatpush3.bf16.msra.mxu1 %v3058_v15 }
  0x11   :  { %3063 = vmatprep.subr.bf16.mxu1 %v3062_v20 }
  0x14   :  { %3065 = vmatpush3.bf16.msra.mxu1 %v3062_v20 }
  0x15   :  { %3088 = vmatprep.subr.msk.bf16.mxu1 %vm3300_vm3, %v3086_v23 }
  0xdb   :  { %v2812_v16 = vpop.f32.mrb[0].mxu0 }
  0xdc   :  { %v132_v17 = vpop.f32.mrb[1].mxu0 }
  0xdd   :  { %2815 = vmatprep.mubr.msk.f32.mxu0 %vm147_vm4, %v132_v17 }
  0xde   :  { %2816 = vmatmul.mubr.msk.f32.vlgmr.msra.gmra.mrb[2].mxu0 %vm147_vm4, %v2812_v16 }
  0xdf   :  { %2841 = vmatprep.mubr.msk.f32.mxu0 %vm55_vm1, %v3307_v4 }
 0x1b1   :  { %v2817_v25 = vpop.f32.mrb[2].mxu0 }
 0x1b2   :  { %v229_v26 = vadd.f32 %v2817_v25, %v3370_v24  ;;  %v223_v27 = vpop.f32.mrb[3].mxu0 }
 0x1b3   :  { %v224_v28 = vadd.f32 %v3370_v24, %v223_v27 }
 0x1b4   :  { %v233_v29 = vmax.f32 %v229_v26, 0.0 }
 0x1b5   :  { %v232_v30 = vmax.f32 %v224_v28, 0.0 }
 0x1b7   :  { %v3379_v32 = vpack.c.bf16 %v233_v29, %v232_v30  ;;  %2834 = vmatprep.mubr.msk.f32.mxu1 %vm234_vm5, %v232_v30 }
 0x1b8   :  { %2835 = vmatmul.mubr.msk.f32.vlgmr.msra.gmra.mrb[0].mxu1 %vm234_vm5, %v233_v29 }
 0x1b9   :  { %3091 = vmatpush3.bf16.msk.msra.mxu1 %vm3300_vm3, %v3086_v23  ;;  %2866 = vmatprep.mubr.msk.f32.mxu1 %vm55_vm1, %v3377_v31  ;;  %v1067_v23 = vld [vmem:[%s3703_s9] sm:$0xff] }
 0x1ba   :  { %3093 = vmatprep.subr.bf16.mxu1 %v3050_v10 }
 0x1bc   :  { %2867 = vmatmul.mubr.msk.f32.vlgmr.msra.gmra.mrb[2].mxu1 %vm55_vm1, %v3390_v33 }
 0x1bd   :  { %3095 = vmatpush3.bf16.msra.mxu1 %v3050_v10 }
 0x1be   :  { %3097 = vmatprep.subr.bf16.mxu1 %v3054_v12 }
 0x1c1   :  { %3099 = vmatpush3.bf16.msra.mxu1 %v3054_v12 }
 0x1c2   :  { %3101 = vmatprep.subr.bf16.mxu1 %v3058_v15 }
 0x1c5   :  { %3103 = vmatpush3.bf16.msra.mxu1 %v3058_v15 }
 0x1c6   :  { %3105 = vmatprep.subr.bf16.mxu1 %v3062_v20 }
 0x1c9   :  { %3107 = vmatpush3.bf16.msra.mxu1 %v3062_v20 }
 0x1ca   :  { %3130 = vmatprep.subr.msk.bf16.mxu1 %vm3300_vm3, %v3379_v32 }
 0x28b   :  { %v2836_v36 = vpop.f32.mrb[0].mxu1 }
 0x28c   :  { %v307_v37 = vpop.f32.mrb[1].mxu1 }
 0x28d   :  { %v3066_v38 = vpack.c.bf16 %v2836_v36, %v307_v37 }
 0x28f   :  { %3068 = vmatprep.subr.msk.bf16.mxu0 %vm3300_vm3, %v3066_v38  ;;  %v2868_v51 = vpop.f32.mrb[2].mxu1 }
 0x290   :  { %3071 = vmatpush3.bf16.msk.msra.mxu0 %vm3300_vm3, %v3066_v38  ;;  %v651_v52 = vpop.f32.mrb[3].mxu1 }
 0x291   :  { %3073 = vmatprep.subr.bf16.mxu0 %v3403_v39 }
 0x293   :  { %2842 = vmatmul.mubr.msk.f32.vlgmr.msra.gmra.mrb[4].mxu0 %vm55_vm1, %v3323_v6 }
 0x294   :  { %3075 = vmatpush3.bf16.msra.mxu0 %v3403_v39 }
 0x295   :  { %3077 = vmatprep.subr.bf16.mxu0 %v3076_v42 }
 0x298   :  { %3079 = vmatpush3.bf16.msra.mxu0 %v3076_v42 }
 0x366   :  { %v2843_v44 = vpop.f32.mrb[4].mxu0 }
 0x367   :  { %v397_v45 = vadd.f32 %v2843_v44, %v2568_v43  ;;  %v391_v46 = vpop.f32.mrb[5].mxu0 }
 0x368   :  { %v392_v47 = vadd.f32 %v2568_v43, %v391_v46 }
 0x369   :  { %v401_v48 = vmax.f32 %v397_v45, 0.0 }
 0x36a   :  { %v400_v49 = vmax.f32 %v392_v47, 0.0 }
 0x36c   :  { %v3422_v50 = vpack.c.bf16 %v401_v48, %v400_v49  ;;  %2852 = vmatprep.mubr.msk.f32.mxu0 %vm402_vm6, %v400_v49 }
 0x36d   :  { %2853 = vmatmul.mubr.msk.f32.vlgmr.msra.gmra.mrb[6].mxu0 %vm402_vm6, %v401_v48  ;;  %v2635_v48 = vld [vmem:[%s3703_s9 + $0x18] sm:$0x3] }
 0x36e   :  { %2859 = vmatprep.mubr.msk.f32.mxu0 %vm55_vm1, %v3307_v4 }
 0x440   :  { %v2854_v53 = vpop.f32.mrb[6].mxu0 }
 0x441   :  { %v475_v54 = vpop.f32.mrb[7].mxu0 }
 0x442   :  { %v3080_v55 = vpack.c.bf16 %v2854_v53, %v475_v54 }
 0x444   :  { %3082 = vmatprep.subr.msk.bf16.mxu0 %vm3300_vm3, %v3080_v55 }
 0x445   :  { %3085 = vmatpush3.bf16.msk.msra.mxu0 %vm3300_vm3, %v3080_v55 }
 0x446   :  { %2869 = vmatprep.subr.msk.mxu0 %vm62_vm0, %v3314_v5 }
 0x448   :  { %2860 = vmatmul.mubr.msk.f32.vlgmr.msra.gmra.mrb[8].mxu0 %vm55_vm1, %v3323_v6 }
 0x449   :  { %2870 = vmatpush3.msk.msra.mxu0 %vm62_vm0, %v3314_v5  ;;  %2871 = vmatprep.mubr.msk.f32.mxu0 %vm147_vm4, %v651_v52 }
 0x44c   :  { %2872 = vmatmul.mubr.msk.f32.vlgmr.msra.gmra.mrb[10].mxu0 %vm147_vm4, %v2868_v51 }
 0x44d   :  { %2897 = vmatprep.mubr.msk.f32.mxu0 %vm55_vm1, %v3377_v31 }
 0x51b   :  { %v2861_v57 = vpop.f32.mrb[8].mxu0 }
 0x51c   :  { %v565_v58 = vadd.f32 %v2861_v57, %v3445_v56  ;;  %v559_v59 = vpop.f32.mrb[9].mxu0 }
 0x51d   :  { %v560_v60 = vadd.f32 %v3445_v56, %v559_v59 }
 0x51e   :  { %v569_v61 = vmax.f32 %v565_v58, 0.0 }
 0x51f   :  { %v568_v62 = vmax.f32 %v560_v60, 0.0  ;;  %v2873_v63 = vpop.f32.mrb[10].mxu0 }
 0x520   :  { %v738_v0 = vadd.f32 %v2873_v63, %v3370_v24  ;;  %v732_v1 = vpop.f32.mrb[11].mxu0 }
 0x521   :  { %v3450_v3 = vpack.c.bf16 %v569_v61, %v568_v62  ;;  %v733_v4 = vadd.f32 %v3370_v24, %v732_v1  ;;  %v1068_v24 = vld [vmem:[%s3703_s9 + $0x8] sm:$0x3] }
 0x522   :  { %v742_v5 = vmax.f32 %v738_v0, 0.0 }
 0x523   :  { %v741_v6 = vmax.f32 %v733_v4, 0.0 }
 0x525   :  { %v3453_v7 = vpack.c.bf16 %v742_v5, %v741_v6  ;;  %2890 = vmatprep.mubr.msk.f32.mxu1 %vm234_vm5, %v741_v6 }
 0x526   :  { %2891 = vmatmul.mubr.msk.f32.vlgmr.msra.gmra.mrb[4].mxu1 %vm234_vm5, %v742_v5 }
 0x527   :  { %3133 = vmatpush3.bf16.msk.msra.mxu1 %vm3300_vm3, %v3379_v32  ;;  %2922 = vmatprep.mubr.msk.f32.mxu1 %vm55_vm1, %v1065_v18 }
 0x52a   :  { %2923 = vmatmul.mubr.msk.f32.vlgmr.msra.gmra.mrb[6].mxu1 %vm55_vm1, %v1066_v19 }
 0x5f9   :  { %v2892_v8 = vpop.f32.mrb[4].mxu1 }
 0x5fa   :  { %v815_v9 = vpop.f32.mrb[5].mxu1 }
 0x5fb   :  { %v3108_v10 = vpack.c.bf16 %v2892_v8, %v815_v9 }
 0x5fd   :  { %3110 = vmatprep.subr.msk.bf16.mxu0 %vm3300_vm3, %v3108_v10  ;;  %v2924_v25 = vpop.f32.mrb[6].mxu1 }
 0x5fe   :  { %3113 = vmatpush3.bf16.msk.msra.mxu0 %vm3300_vm3, %v3108_v10  ;;  %v1143_v26 = vpop.f32.mrb[7].mxu1 }
 0x5ff   :  { %3115 = vmatprep.subr.bf16.mxu0 %v3403_v39  ;;  %2936 = vmatprep.mubr.msk.f32.mxu1 %vm234_vm5, %v1143_v26 }
 0x601   :  { %2898 = vmatmul.mubr.msk.f32.vlgmr.msra.gmra.mrb[12].mxu0 %vm55_vm1, %v3390_v33 }
 0x602   :  { %3117 = vmatpush3.bf16.msra.mxu0 %v3403_v39 }
 0x603   :  { %3119 = vmatprep.subr.bf16.mxu0 %v3076_v42 }
 0x606   :  { %3121 = vmatpush3.bf16.msra.mxu0 %v3076_v42 }
 0x6d4   :  { %v2899_v11 = vpop.f32.mrb[12].mxu0 }
 0x6d5   :  { %v899_v12 = vadd.f32 %v2899_v11, %v2568_v43  ;;  %v893_v13 = vpop.f32.mrb[13].mxu0 }
 0x6d6   :  { %v894_v14 = vadd.f32 %v2568_v43, %v893_v13  ;;  %v2633_v43 = vld [vmem:[%s3702_s8 + $0x18] sm:$0x3] }
 0x6d7   :  { %v903_v15 = vmax.f32 %v899_v12, 0.0 }
 0x6d8   :  { %v902_v16 = vmax.f32 %v894_v14, 0.0 }
 0x6da   :  { %v3468_v17 = vpack.c.bf16 %v903_v15, %v902_v16  ;;  %2908 = vmatprep.mubr.msk.f32.mxu0 %vm402_vm6, %v902_v16 }
 0x6db   :  { %2909 = vmatmul.mubr.msk.f32.vlgmr.msra.gmra.mrb[14].mxu0 %vm402_vm6, %v903_v15 }
 0x6dc   :  { %2915 = vmatprep.mubr.msk.f32.mxu0 %vm55_vm1, %v3377_v31 }
 0x7ae   :  { %v2910_v20 = vpop.f32.mrb[14].mxu0 }
 0x7af   :  { %v976_v21 = vpop.f32.mrb[15].mxu0 }
 0x7b0   :  { %v3122_v22 = vpack.c.bf16 %v2910_v20, %v976_v21 }
 0x7b2   :  { %3124 = vmatprep.subr.msk.bf16.mxu0 %vm3300_vm3, %v3122_v22 }
 0x7b3   :  { %3127 = vmatpush3.bf16.msk.msra.mxu0 %vm3300_vm3, %v3122_v22 }
 0x7b4   :  { %3136 = vmatprep.subr.msk.bf16.mxu0 %vm3300_vm3, %v3453_v7 }
 0x7b6   :  { %2916 = vmatmul.mubr.msk.f32.vlgmr.msra.gmra.mrb[16].mxu0 %vm55_vm1, %v3390_v33 }
 0x7b7   :  { %3139 = vmatpush3.bf16.msk.msra.mxu0 %vm3300_vm3, %v3453_v7  ;;  %2929 = vmatprep.mubr.msk.f32.mxu0 %vm55_vm1, %v1067_v23 }
 0x7b8   :  { %3148 = vmatprep.subr.msk.bf16.mxu0 %vm3300_vm3, %v3422_v50 }
 0x7ba   :  { %2930 = vmatmul.mubr.msk.f32.vlgmr.msra.gmra.mrb[18].mxu0 %vm55_vm1, %v1068_v24 }
 0x7bb   :  { %3151 = vmatpush3.bf16.msk.msra.mxu0 %vm3300_vm3, %v3422_v50  ;;  %2943 = vmatprep.mubr.msk.f32.mxu0 %vm55_vm1, %v1065_v18 }
 0x7bc   :  { %3154 = vmatprep.subr.msk.bf16.mxu0 %vm3300_vm3, %v3468_v17 }
 0x7be   :  { %2944 = vmatmul.mubr.msk.f32.vlgmr.msra.gmra.mrb[20].mxu0 %vm55_vm1, %v1066_v19 }
 0x7bf   :  { %3157 = vmatpush3.bf16.msk.msra.mxu0 %vm3300_vm3, %v3468_v17  ;;  %2950 = vmatprep.mubr.msk.f32.mxu0 %vm55_vm1, %v1067_v23 }
 0x7c0   :  { %3166 = vmatprep.subr.msk.bf16.mxu0 %vm3300_vm3, %v3450_v3 }
 0x7c2   :  { %2951 = vmatmul.mubr.msk.f32.vlgmr.msra.gmra.mrb[22].mxu0 %vm55_vm1, %v1068_v24 }
 0x7c3   :  { %3169 = vmatpush3.bf16.msk.msra.mxu0 %vm3300_vm3, %v3450_v3  ;;  %2964 = vmatprep.mubr.msk.f32.mxu0 %vm55_vm1, %v1065_v18 }
 0x7c6   :  { %2965 = vmatmul.mubr.msk.f32.vlgmr.msra.gmra.mrb[24].mxu0 %vm55_vm1, %v1066_v19 }
 0x7c7   :  { %2971 = vmatprep.mubr.msk.f32.mxu0 %vm55_vm1, %v1067_v23 }
 0x889   :  { %v2917_v27 = vpop.f32.mrb[16].mxu0 }
 0x88a   :  { %v1060_v28 = vadd.f32 %v2917_v27, %v3445_v56  ;;  %v1054_v29 = vpop.f32.mrb[17].mxu0 }
 0x88b   :  { %v1055_v30 = vadd.f32 %v3445_v56, %v1054_v29 }
 0x88c   :  { %v1064_v31 = vmax.f32 %v1060_v28, 0.0 }
 0x88d   :  { %v1063_v33 = vmax.f32 %v1055_v30, 0.0  ;;  %v2931_v34 = vpop.f32.mrb[18].mxu0 }
 0x88e   :  { %v1226_v35 = vpop.f32.mrb[19].mxu0 }
 0x88f   :  { %v3170_v37 = vpack.c.bf16 %v1064_v31, %v1063_v33  ;;  %v3140_v38 = vpack.c.bf16 %v2931_v34, %v1226_v35 }
 0x891   :  { %3172 = vmatprep.subr.msk.bf16.mxu0 %vm3300_vm3, %v3170_v37  ;;  %3142 = vmatprep.subr.msk.bf16.mxu1 %vm3532_vm7, %v3140_v38  ;;  %v2945_v39 = vpop.f32.mrb[20].mxu0 }
 0x892   :  { %3175 = vmatpush3.bf16.msk.msra.mxu0 %vm3300_vm3, %v3170_v37  ;;  %3145 = vmatpush3.bf16.xpose.msk.msra.mxu1 %vm3532_vm7, %v3140_v38  ;;  %v1394_v40 = vpop.f32.mrb[21].mxu0 }
 0x893   :  { %3184 = vmatprep.subr.msk.bf16.mxu0 %vm3300_vm3, %v3379_v32 }
 0x895   :  { %2972 = vmatmul.mubr.msk.f32.vlgmr.msra.gmra.mrb[26].mxu0 %vm55_vm1, %v1068_v24  ;;  %v2952_v42 = vpop.f32.mrb[22].mxu0 }
 0x896   :  { %3187 = vmatpush3.bf16.msk.msra.mxu0 %vm3300_vm3, %v3379_v32  ;;  %2985 = vmatprep.mubr.msk.f32.mxu0 %vm55_vm1, %v2632_v41  ;;  %v1471_v44 = vpop.f32.mrb[23].mxu0  ;;  %v2634_v32 = vld [vmem:[%s3703_s9 + $0x10] sm:$0xff] }
 0x897   :  { %3190 = vmatprep.subr.msk.bf16.mxu0 %vm3300_vm3, %v3453_v7  ;;  %v3158_v46 = vpack.c.bf16 %v2952_v42, %v1471_v44 }
 0x899   :  { %2986 = vmatmul.mubr.msk.f32.vlgmr.msra.gmra.mrb[28].mxu0 %vm55_vm1, %v2633_v43  ;;  %3160 = vmatprep.subr.msk.bf16.mxu1 %vm3560_vm8, %v3158_v46  ;;  %v2966_v47 = vpop.f32.mrb[24].mxu0 }
 0x89a   :  { %3193 = vmatpush3.bf16.msk.msra.mxu0 %vm3300_vm3, %v3453_v7  ;;  %2992 = vmatprep.mubr.msk.f32.mxu0 %vm55_vm1, %v2634_v32  ;;  %v1639_v49 = vpop.f32.mrb[25].mxu0 }
 0x89b   :  { %3202 = vmatprep.subr.msk.bf16.mxu0 %vm3300_vm3, %v3422_v50  ;;  %2937 = vmatmul.mubr.msk.f32.vlgmr.msra.gmra.mrb[8].mxu1 %vm234_vm5, %v2924_v25 }
 0x89c   :  { %3163 = vmatpush3.bf16.xpose.msk.msra.mxu1 %vm3560_vm8, %v3158_v46  ;;  %2957 = vmatprep.mubr.msk.f32.mxu1 %vm402_vm6, %v1394_v40 }
 0x89d   :  { %2993 = vmatmul.mubr.msk.f32.vlgmr.msra.gmra.mrb[30].mxu0 %vm55_vm1, %v2635_v48 }
 0x89e   :  { %3205 = vmatpush3.bf16.msk.msra.mxu0 %vm3300_vm3, %v3422_v50  ;;  %3006 = vmatprep.mubr.msk.f32.mxu0 %vm55_vm1, %v2632_v41 }
 0x89f   :  { %3208 = vmatprep.subr.msk.bf16.mxu0 %vm3300_vm3, %v3468_v17 }
 0x8a1   :  { %3007 = vmatmul.mubr.msk.f32.vlgmr.msra.gmra.mrb[32].mxu0 %vm55_vm1, %v2633_v43 }
 0x8a2   :  { %3211 = vmatpush3.bf16.msk.msra.mxu0 %vm3300_vm3, %v3468_v17  ;;  %3013 = vmatprep.mubr.msk.f32.mxu0 %vm55_vm1, %v2634_v32 }
 0x8a3   :  { %3220 = vmatprep.subr.msk.bf16.mxu0 %vm3300_vm3, %v3450_v3  ;;  %2958 = vmatmul.mubr.msk.f32.vlgmr.msra.gmra.mrb[10].mxu1 %vm402_vm6, %v2945_v39 }
 0x8a4   :  { %2978 = vmatprep.mubr.msk.f32.mxu1 %vm1726_vm9, %v1639_v49 }
 0x8a5   :  { %3014 = vmatmul.mubr.msk.f32.vlgmr.msra.gmra.mrb[34].mxu0 %vm55_vm1, %v2635_v48 }
 0x8a6   :  { %3223 = vmatpush3.bf16.msk.msra.mxu0 %vm3300_vm3, %v3450_v3  ;;  %3027 = vmatprep.mubr.msk.f32.mxu0 %vm55_vm1, %v2632_v41 }
 0x8a7   :  { %3226 = vmatprep.subr.msk.bf16.mxu0 %vm3300_vm3, %v3170_v37 }
 0x8a9   :  { %3028 = vmatmul.mubr.msk.f32.vlgmr.msra.gmra.mrb[36].mxu0 %vm55_vm1, %v2633_v43 }
 0x8aa   :  { %3229 = vmatpush3.bf16.msk.msra.mxu0 %vm3300_vm3, %v3170_v37  ;;  %3034 = vmatprep.mubr.msk.f32.mxu0 %vm55_vm1, %v2634_v32 }
 0x8ad   :  { %3035 = vmatmul.mubr.msk.f32.vlgmr.msra.gmra.mrb[38].mxu0 %vm55_vm1, %v2635_v48 }
 0x968   :  { %v2973_v50 = vpop.f32.mrb[26].mxu0 }
 0x969   :  { %v1717_v51 = vpop.f32.mrb[27].mxu0 }
 0x96a   :  { %v3176_v53 = vpack.c.bf16 %v2973_v50, %v1717_v51 }
 0x96c   :  { %3178 = vmatprep.subr.msk.bf16.mxu1 %vm3619_vm10, %v3176_v53  ;;  %v2987_v54 = vpop.f32.mrb[28].mxu0 }
 0x96d   :  { %3181 = vmatpush3.bf16.xpose.msk.msra.mxu1 %vm3619_vm10, %v3176_v53  ;;  %v1895_v2 = vpop.f32.mrb[29].mxu0 }
 0x96e   :  { %v2938_v55 = vpop.f32.mrb[8].mxu1 }
 0x96f   :  { %1325 = vst.msk [vmem:[%s3704_s10 + $0x8] sm:$0x3] %vm1324_vm11, %v2938_v55  ;;  %v1313_v56 = vpop.f32.mrb[9].mxu1 }
 0x970   :  { %v2994_v57 = vpop.f32.mrb[30].mxu0  ;;  %1323 = vst.msk [vmem:[%s3704_s10] sm:$0xff] %vm1322_vm12, %v1313_v56 }
 0x971   :  { %v1976_v58 = vpop.f32.mrb[31].mxu0 }
 0x972   :  { %v3194_v59 = vpack.c.bf16 %v2994_v57, %v1976_v58 }
 0x974   :  { %2979 = vmatmul.mubr.msk.f32.vlgmr.msra.gmra.mrb[12].mxu1 %vm1726_vm9, %v2966_v47  ;;  %3196 = vmatprep.subr.msk.bf16.mxu1 %vm3532_vm7, %v3194_v59  ;;  %v3008_v60 = vpop.f32.mrb[32].mxu0 }
 0x975   :  { %3199 = vmatpush3.bf16.xpose.msk.msra.mxu1 %vm3532_vm7, %v3194_v59  ;;  %2999 = vmatprep.mubr.msk.f32.mxu1 %vm234_vm5, %v1895_v2  ;;  %v2141_v61 = vpop.f32.mrb[33].mxu0 }
 0x976   :  { %v2959_v62 = vpop.f32.mrb[10].mxu1 }
 0x977   :  { %2619 = vst.msk [vmem:[%s3704_s10 + $0x18] sm:$0x3] %vm1324_vm11, %v2959_v62  ;;  %v1558_v63 = vpop.f32.mrb[11].mxu1 }
 0x978   :  { %v3015_v0 = vpop.f32.mrb[34].mxu0  ;;  %2618 = vst.msk [vmem:[%s3704_s10 + $0x10] sm:$0xff] %vm1322_vm12, %v1558_v63 }
 0x979   :  { %v2216_v1 = vpop.f32.mrb[35].mxu0 }
 0x97a   :  { %v3212_v3 = vpack.c.bf16 %v3015_v0, %v2216_v1 }
 0x97c   :  { %3000 = vmatmul.mubr.msk.f32.vlgmr.msra.gmra.mrb[14].mxu1 %vm234_vm5, %v2987_v54  ;;  %3214 = vmatprep.subr.msk.bf16.mxu1 %vm3560_vm8, %v3212_v3  ;;  %v3029_v4 = vpop.f32.mrb[36].mxu0 }
 0x97d   :  { %3217 = vmatpush3.bf16.xpose.msk.msra.mxu1 %vm3560_vm8, %v3212_v3  ;;  %3020 = vmatprep.mubr.msk.f32.mxu1 %vm402_vm6, %v2141_v61  ;;  %v2381_v5 = vpop.f32.mrb[37].mxu0 }
 0x980   :  { %v3036_v6 = vpop.f32.mrb[38].mxu0 }
 0x981   :  { %v2456_v7 = vpop.f32.mrb[39].mxu0 }
 0x982   :  { %v3230_v8 = vpack.c.bf16 %v3036_v6, %v2456_v7 }
 0x984   :  { %3021 = vmatmul.mubr.msk.f32.vlgmr.msra.gmra.mrb[16].mxu1 %vm402_vm6, %v3008_v60  ;;  %3232 = vmatprep.subr.msk.bf16.mxu1 %vm3619_vm10, %v3230_v8 }
 0x985   :  { %3235 = vmatpush3.bf16.xpose.msk.msra.mxu1 %vm3619_vm10, %v3230_v8  ;;  %3041 = vmatprep.mubr.msk.f32.mxu1 %vm1726_vm9, %v2381_v5 }
 0x98c   :  { %3042 = vmatmul.mubr.msk.f32.vlgmr.msra.gmra.mrb[18].mxu1 %vm1726_vm9, %v3029_v4 }
 0xa47   :  { %v2980_v9 = vpop.f32.mrb[12].mxu1 }
 0xa48   :  { %2631 = vst.msk [vmem:[%s3704_s10 + $0x28] sm:$0x3] %vm1324_vm11, %v2980_v9  ;;  %v1805_v10 = vpop.f32.mrb[13].mxu1 }
 0xa49   :  { %2630 = vst.msk [vmem:[%s3704_s10 + $0x20] sm:$0xff] %vm1322_vm12, %v1805_v10 }
 0xa4f   :  { %v3001_v11 = vpop.f32.mrb[14].mxu1 }
 0xa50   :  { %2647 = vst.msk [vmem:[%s3704_s10 + $0x38] sm:$0x3] %vm1324_vm11, %v3001_v11  ;;  %v2063_v12 = vpop.f32.mrb[15].mxu1 }
 0xa51   :  { %2646 = vst.msk [vmem:[%s3704_s10 + $0x30] sm:$0xff] %vm1322_vm12, %v2063_v12 }
 0xa57   :  { %v3022_v13 = vpop.f32.mrb[16].mxu1 }
 0xa58   :  { %2659 = vst.msk [vmem:[%s3704_s10 + $0x48] sm:$0x3] %vm1324_vm11, %v3022_v13  ;;  %v2303_v14 = vpop.f32.mrb[17].mxu1 }
 0xa59   :  { %2658 = vst.msk [vmem:[%s3704_s10 + $0x40] sm:$0xff] %vm1322_vm12, %v2303_v14 }
 0xa5f   :  { %v3043_v15 = vpop.f32.mrb[18].mxu1 }
 0xa60   :  { %2671 = vst.msk [vmem:[%s3704_s10 + $0x58] sm:$0x3] %vm1324_vm11, %v3043_v15  ;;  %v2543_v16 = vpop.f32.mrb[19].mxu1 }
 0xa61   :  { %2670 = vst.msk [vmem:[%s3704_s10 + $0x50] sm:$0xff] %vm1322_vm12, %v2543_v16 }

</bundles_post_ra>
